<compile_context>
chip_gen: v7x
topology: tpu7x:2x2x1
jax: 0.10.0
libtpu: 0.0.40
codegen_flags: <defaults>
</compile_context>

<pallas_src>
import functools
import math

import jax
import jax.numpy as jnp
from jax.experimental import pallas as pl
from jax.experimental.pallas import tpu as pltpu


def _round_up(n, m):
    return ((n + m - 1) // m) * m


def _attention_head_kernel(x_ref, wqkv_ref, bqkv_ref, o_ref, *, scale, dm):
    """One grid step = one batch tile.

    x_ref    : (bt, S, D)    VMEM tile, input dtype (f32)
    wqkv_ref : (D, 3*blk)    VMEM fused weights, MXU dtype, blk = round_up(D,128)
    bqkv_ref : (1, 3*blk)    VMEM fused bias, f32
    o_ref    : (bt, S*D)     VMEM lane-dense output slab
    """
    bt, seq, _ = x_ref.shape
    blk = wqkv_ref.shape[1] // 3
    mxu_dt = wqkv_ref.dtype

    # Fused QKV projection: one MXU push, f32 accumulation, f32 bias add.
    x = x_ref[...].reshape(bt * seq, dm).astype(mxu_dt)
    qkv = jnp.dot(x, wqkv_ref[...], preferred_element_type=jnp.float32)
    qkv = qkv + bqkv_ref[...]

    # Lane-tile-aligned slices (starts at 0 / blk / 2*blk, multiples of 128).
    q = qkv[:, 0 * blk:1 * blk].reshape(bt, seq, blk)
    k = qkv[:, 1 * blk:2 * blk].reshape(bt, seq, blk)
    v = qkv[:, 2 * blk:3 * blk].reshape(bt, seq, blk)

    # Scaled scores: contract the (padded) feature dim directly; padded lanes
    # are exactly zero so the result is unchanged.
    scores = jnp.einsum("bqd,bkd->bqk",
                        q.astype(mxu_dt), k.astype(mxu_dt),
                        preferred_element_type=jnp.float32) * scale

    # Numerically-stable softmax, all f32, exact division (no approx recip).
    m = jnp.max(scores, axis=-1, keepdims=True)
    p = jnp.exp(scores - m)
    attn = p / jnp.sum(p, axis=-1, keepdims=True)

    # Weighted sum of values, f32 accumulation.
    out = jnp.einsum("bqk,bkd->bqd",
                     attn.astype(mxu_dt), v.astype(mxu_dt),
                     preferred_element_type=jnp.float32)

    # Drop padded lanes, store lane-dense (last dim S*D -> unmasked vst).
    # TODO(synk): at large bt, dump bundles and compare against a plain
    # (bt, S, D) out_spec in case the sublane->lane repack saturates the XLU.
    o_ref[...] = out[:, :, :dm].reshape(bt, seq * dm).astype(o_ref.dtype)


def fuse_qkv_params(wq, bq, wk, bk, wv, bv, *, mxu_dtype=jnp.bfloat16):
    """Fuse PyTorch-layout (out, in) Q/K/V linear params into one padded
    (D, 3*blk) weight and a (1, 3*blk) f32 bias.  Call ONCE at init time
    (hoisted out of the per-call path)."""
    d_model = wq.shape[0]
    blk = _round_up(d_model, 128)
    pad = blk - d_model

    def pw(w):  # (out, in) -> (in, blk), zero-padded lanes
        return jnp.pad(jnp.asarray(w, jnp.float32).T, ((0, 0), (0, pad)))

    def pb(b):
        return jnp.pad(jnp.asarray(b, jnp.float32), (0, pad))

    wqkv = jnp.concatenate([pw(wq), pw(wk), pw(wv)], axis=1).astype(mxu_dtype)
    bqkv = jnp.concatenate([pb(bq), pb(bk), pb(bv)]).reshape(1, 3 * blk)
    return wqkv, bqkv


def _select_batch_tile(batch):
    """Batch-tile selection.

    Small B: one grid step (the whole problem is launch/overhead bound).
    Large B: large power-of-two tiles, capped at 256.  Padded per-row VMEM
    footprint (D=32 -> 128 lanes, qkv/q/k/v/scores intermediates, double-
    buffered x / out) is ~50 KiB, so bt=256 ~ 13 MiB -- safe on all
    generations including v7x (64 MiB physical VMEM).  bt <= B//4 keeps
    >= 4 grid steps so the "parallel" batch axis can shard across v7x's two
    TensorCores.
    """
    if batch <= 16:
        return batch
    bt = min(256, max(16, batch // 4))
    return 1 << (bt.bit_length() - 1)   # round down to a power of two


@functools.partial(jax.jit, static_argnames=("head_size",))
def attention_head_fused(x, wqkv, bqkv, head_size):
    """x: (B, S, D) f32.  wqkv: (D, 3*blk) pre-fused (see fuse_qkv_params).
    bqkv: (1, 3*blk) f32.  Returns (B, S, D) in x.dtype."""
    batch, seq, d_model = x.shape
    blk = bqkv.shape[-1] // 3
    scale = 1.0 / math.sqrt(head_size)

    bt = _select_batch_tile(batch)
    num_steps = pl.cdiv(batch, bt)
    batch_pad = num_steps * bt
    if batch_pad != batch:
        # Pad awkward (non-multiple) batch sizes instead of shrinking the tile.
        x = jnp.pad(x, ((0, batch_pad - batch), (0, 0), (0, 0)))

    grid = (num_steps,)
    sem = ("parallel",) if num_steps > 1 else ("arbitrary",)

    kernel = functools.partial(_attention_head_kernel, scale=scale, dm=d_model)

    out_flat = pl.pallas_call(
        kernel,
        out_shape=jax.ShapeDtypeStruct((batch_pad, seq * d_model), x.dtype),
        grid_spec=pltpu.PrefetchScalarGridSpec(
            num_scalar_prefetch=0,
            grid=grid,
            in_specs=[
                pl.BlockSpec((bt, seq, d_model), lambda i: (i, 0, 0)),   # x
                pl.BlockSpec((d_model, 3 * blk), lambda i: (0, 0)),      # Wqkv
                pl.BlockSpec((1, 3 * blk), lambda i: (0, 0)),            # bias
            ],
            out_specs=pl.BlockSpec((bt, seq * d_model), lambda i: (i, 0)),
        ),
        compiler_params=pltpu.CompilerParams(
            dimension_semantics=sem,
            # Raise the scoped VMEM limit above the 16/32 MiB defaults once the
            # tile is large; 48 MiB still leaves headroom on v7x's 64 MiB VMEM.
            vmem_limit_bytes=(48 * 1024 * 1024 if bt >= 128 else None),
        ),
    )(x, wqkv, bqkv)

    out = out_flat.reshape(batch_pad, seq, d_model)
    return out[:batch] if batch_pad != batch else out


def attention_head(x, wq, bq, wk, bk, wv, bv, head_size, *, mxu_dtype=jnp.bfloat16):
    """Convenience wrapper taking PyTorch-layout params.  In real use, hoist
    fuse_qkv_params() to init time; this path re-fuses on every call."""
    wqkv, bqkv = fuse_qkv_params(wq, bq, wk, bk, wv, bv, mxu_dtype=mxu_dtype)
    return attention_head_fused(x, wqkv, bqkv, head_size)


def attention_head_ref(x, wq, bq, wk, bk, wv, bv, head_size):
    """Pure-JAX reference matching the PyTorch forward."""
    q = x @ wq.T + bq
    k = x @ wk.T + bk
    v = x @ wv.T + bv
    scores = (q @ jnp.swapaxes(k, -2, -1)) / math.sqrt(head_size)
    attn = jax.nn.softmax(scores, axis=-1)
    return attn @ v


if __name__ == "__main__":
    # Small shapes consistent with the module: B=2, S=8 tokens, d_model=32,
    # head_size = d_model // num_heads (num_heads=4) = 8.
    B, S, D = 2, 8, 32
    head_size = 8

    key = jax.random.PRNGKey(0)
    kx, kq, kbq, kk, kbk, kv, kbv, kx2 = jax.random.split(key, 8)

    bound = 1.0 / math.sqrt(D)
    x = jax.random.normal(kx, (B, S, D), dtype=jnp.float32)
    wq = jax.random.uniform(kq, (D, D), jnp.float32, -bound, bound)
    bq = jax.random.uniform(kbq, (D,), jnp.float32, -bound, bound)
    wk = jax.random.uniform(kk, (D, D), jnp.float32, -bound, bound)
    bk = jax.random.uniform(kbk, (D,), jnp.float32, -bound, bound)
    wv = jax.random.uniform(kv, (D, D), jnp.float32, -bound, bound)
    bv = jax.random.uniform(kbv, (D,), jnp.float32, -bound, bound)

    # Hoisted, once-at-init parameter fusion (f32 and bf16 MXU variants).
    wqkv_f32, bqkv = fuse_qkv_params(wq, bq, wk, bk, wv, bv, mxu_dtype=jnp.float32)
    wqkv_bf16, _ = fuse_qkv_params(wq, bq, wk, bk, wv, bv, mxu_dtype=jnp.bfloat16)

    ref = attention_head_ref(x, wq, bq, wk, bk, wv, bv, head_size)

    # f32 MXU operands: exact softmax division restores the tight tolerance.
    out_f32 = jax.block_until_ready(attention_head_fused(x, wqkv_f32, bqkv, head_size))
    assert out_f32.shape == (B, S, D)
    assert jnp.allclose(out_f32, ref, atol=1e-5, rtol=1e-5), "f32 path mismatch"

    # bf16 MXU operands (v6e/v7x fast path): f32 accumulation + f32 softmax.
    out_bf16 = jax.block_until_ready(attention_head_fused(x, wqkv_bf16, bqkv, head_size))
    assert jnp.allclose(out_bf16, ref, atol=3e-2, rtol=3e-2), "bf16 path mismatch"

    # Larger, non-multiple batch: exercises batch tiling + wrapper padding +
    # the multi-step "parallel" grid path.
    B2 = 40
    x2 = jax.random.normal(kx2, (B2, S, D), dtype=jnp.float32)
    ref2 = attention_head_ref(x2, wq, bq, wk, bk, wv, bv, head_size)
    out2 = jax.block_until_ready(attention_head_fused(x2, wqkv_f32, bqkv, head_size))
    assert out2.shape == (B2, S, D)
    assert jnp.allclose(out2, ref2, atol=1e-5, rtol=1e-5), "tiled path mismatch"

    print("KERNEL_OK")
</pallas_src>

<mosaic_0001>
module attributes {stable_mosaic.version = 11 : i64} {
  func.func @_attention_head_kernel(%arg0: i32, %arg1: memref<2x8x32xf32, #tpu.memory_space<vmem>>, %arg2: memref<32x384xf32, #tpu.memory_space<vmem>>, %arg3: memref<1x384xf32, #tpu.memory_space<vmem>>, %arg4: memref<2x256xf32, #tpu.memory_space<vmem>>) attributes {dimension_semantics = [#tpu.dimension_semantics<arbitrary>], iteration_bounds = array<i64: 1>, scalar_prefetch = 0 : i64, scratch_operands = 0 : i64, tpu.core_type = #tpu.core_type<tc>, window_params = [{transform_indices = @transform_0, window_bounds = array<i64: 2, 8, 32>}, {pipeline_mode = #tpu.pipeline_mode<synchronous>, transform_indices = @transform_1, window_bounds = array<i64: 32, 384>}, {pipeline_mode = #tpu.pipeline_mode<synchronous>, transform_indices = @transform_2, window_bounds = array<i64: 1, 384>}, {transform_indices = @transform_3, window_bounds = array<i64: 2, 256>}]} {
    %c0 = arith.constant 0 : index
    %c0_0 = arith.constant 0 : index
    %c0_1 = arith.constant 0 : index
    %0 = vector.load %arg1[%c0, %c0_0, %c0_1] : memref<2x8x32xf32, #tpu.memory_space<vmem>>, vector<2x8x32xf32>
    %1 = vector.shape_cast %0 : vector<2x8x32xf32> to vector<16x32xf32>
    %c0_2 = arith.constant 0 : index
    %c0_3 = arith.constant 0 : index
    %2 = vector.load %arg2[%c0_2, %c0_3] : memref<32x384xf32, #tpu.memory_space<vmem>>, vector<32x384xf32>
    %cst = arith.constant dense<0.000000e+00> : vector<16x384xf32>
    %3 = tpu.matmul %1, %2, %cst {dimension_numbers = #tpu.dot_dimension_numbers<[1], [0], [0], [1], [0, 0, 1, 1], [], []>} : vector<16x32xf32>, vector<32x384xf32>, vector<16x384xf32> -> vector<16x384xf32>
    %c0_4 = arith.constant 0 : index
    %c0_5 = arith.constant 0 : index
    %4 = vector.load %arg3[%c0_4, %c0_5] : memref<1x384xf32, #tpu.memory_space<vmem>>, vector<1x384xf32>
    %5 = vector.broadcast %4 : vector<1x384xf32> to vector<16x384xf32>
    %6 = arith.addf %3, %5 : vector<16x384xf32>
    %7 = vector.extract_strided_slice %6 {offsets = [0, 0], sizes = [16, 128], strides = [1, 1]} : vector<16x384xf32> to vector<16x128xf32>
    %8 = vector.shape_cast %7 : vector<16x128xf32> to vector<2x8x128xf32>
    %9 = vector.extract_strided_slice %6 {offsets = [0, 128], sizes = [16, 128], strides = [1, 1]} : vector<16x384xf32> to vector<16x128xf32>
    %10 = vector.shape_cast %9 : vector<16x128xf32> to vector<2x8x128xf32>
    %11 = vector.extract_strided_slice %6 {offsets = [0, 256], sizes = [16, 128], strides = [1, 1]} : vector<16x384xf32> to vector<16x128xf32>
    %12 = vector.shape_cast %11 : vector<16x128xf32> to vector<2x8x128xf32>
    "tpu.trace_start"() <{level = 10 : i32, message = "bqd,bkd->bqk"}> : () -> ()
    %cst_6 = arith.constant dense<0.000000e+00> : vector<2x8x8xf32>
    %13 = tpu.matmul %8, %10, %cst_6 {dimension_numbers = #tpu.dot_dimension_numbers<[2], [2], [1], [1], [0, 0, 0, 1, 1, 1], [0], [0]>} : vector<2x8x128xf32>, vector<2x8x128xf32>, vector<2x8x8xf32> -> vector<2x8x8xf32>
    "tpu.trace_stop"() : () -> ()
    %cst_7 = arith.constant 0.353553385 : f32
    %14 = vector.broadcast %cst_7 : f32 to vector<2x8x8xf32>
    %15 = arith.mulf %13, %14 : vector<2x8x8xf32>
    %cst_8 = arith.constant dense<0xFF800000> : vector<2x8xf32>
    %16 = vector.multi_reduction <maximumf>, %15, %cst_8 [2] : vector<2x8x8xf32> to vector<2x8xf32>
    %17 = vector.shape_cast %16 : vector<2x8xf32> to vector<2x8x1xf32>
    %18 = vector.broadcast %17 : vector<2x8x1xf32> to vector<2x8x8xf32>
    %19 = arith.subf %15, %18 : vector<2x8x8xf32>
    %20 = math.exp %19 : vector<2x8x8xf32>
    %cst_9 = arith.constant dense<0.000000e+00> : vector<2x8xf32>
    %21 = vector.multi_reduction <add>, %20, %cst_9 [2] : vector<2x8x8xf32> to vector<2x8xf32>
    %22 = vector.shape_cast %21 : vector<2x8xf32> to vector<2x8x1xf32>
    %23 = vector.broadcast %22 : vector<2x8x1xf32> to vector<2x8x8xf32>
    %24 = arith.divf %20, %23 : vector<2x8x8xf32>
    "tpu.trace_start"() <{level = 10 : i32, message = "bqk,bkd->bqd"}> : () -> ()
    %cst_10 = arith.constant dense<0.000000e+00> : vector<2x8x128xf32>
    %25 = tpu.matmul %24, %12, %cst_10 {dimension_numbers = #tpu.dot_dimension_numbers<[2], [1], [1], [2], [0, 0, 0, 1, 1, 2], [0], [0]>} : vector<2x8x8xf32>, vector<2x8x128xf32>, vector<2x8x128xf32> -> vector<2x8x128xf32>
    "tpu.trace_stop"() : () -> ()
    %26 = vector.extract_strided_slice %25 {offsets = [0, 0, 0], sizes = [2, 8, 32], strides = [1, 1, 1]} : vector<2x8x128xf32> to vector<2x8x32xf32>
    %27 = vector.shape_cast %26 : vector<2x8x32xf32> to vector<2x256xf32>
    %c0_11 = arith.constant 0 : index
    %c0_12 = arith.constant 0 : index
    %28 = vector.load %arg4[%c0_11, %c0_12] : memref<2x256xf32, #tpu.memory_space<vmem>>, vector<2x256xf32>
    tpu.vector_store %arg4[%c0_11, %c0_12], %27 {strides = array<i32>} : memref<2x256xf32, #tpu.memory_space<vmem>>, vector<2x256xf32>,
    return
  }
  func.func @transform_0(%arg0: i32) -> (i32, i32, i32) {
    %c0_i32 = arith.constant 0 : i32
    %c0_i32_0 = arith.constant 0 : i32
    %c0_i32_1 = arith.constant 0 : i32
    return %arg0, %c0_i32, %c0_i32_0 : i32, i32, i32
  }
  func.func @transform_1(%arg0: i32) -> (i32, i32) {
    %c0_i32 = arith.constant 0 : i32
    %c0_i32_0 = arith.constant 0 : i32
    %c0_i32_1 = arith.constant 0 : i32
    return %c0_i32, %c0_i32_0 : i32, i32
  }
  func.func @transform_2(%arg0: i32) -> (i32, i32) {
    %c0_i32 = arith.constant 0 : i32
    %c0_i32_0 = arith.constant 0 : i32
    %c0_i32_1 = arith.constant 0 : i32
    return %c0_i32, %c0_i32_0 : i32, i32
  }
  func.func @transform_3(%arg0: i32) -> (i32, i32) {
    %c0_i32 = arith.constant 0 : i32
    %c0_i32_0 = arith.constant 0 : i32
    return %arg0, %c0_i32 : i32, i32
  }
}

</mosaic_0001>

<bundles_post_ra>
// kernel: attention_head_fused.1
= control target key start
LH: loop header
LB: loop body
LE: loop exit
PB: predicated region body
PF: predicated region fallthrough
CT: control target
= control target key end

     0   :  { %8 = vsyncpa [#allocation3], 0  ;;  %s898_s0 = inlined_call_operand.hbm [shape: f32[2,8,32], index: 0, kind: input, shape index: {}]   ;;  %s899_s1 = inlined_call_operand.hbm [shape: f32[32,384], index: 1, kind: input, shape index: {}]   ;;  %s900_s2 = inlined_call_operand.vmem [shape: f32[1,384], index: 2, kind: input, shape index: {}]   ;;  %s901_s3 = inlined_call_operand.vmem [shape: f32[2,256], index: 3, kind: output, shape index: {}]  }
   0x1   :  { %9 = vsyncpa [#allocation5], 0  ;;  %s796_s12 = smov [#allocation2]   ;;  %s748_s16 = scalar_lea.hbm %s898_s0, 256 }
   0x2   :  { %s15_s13 = sshll.u32 %s796_s12, 4  ;;  %p749_p0 = scmp.ne.s32.totalorder %s898_s0, %s748_s16  ;;  %s16_s13 = int_to_ptr.vmem [resolvable:$true] %s15_s13 }
   0x3   :  { %p752_p1 = scmp.lt.u32.totalorder %s748_s16, %s898_s0 }
   0x5   :  { %p754_p2 = pnand %p752_p1, %p749_p0 }
   0x7   :  { %757 = shalt.err (!%p754_p2)
}
   0x8   :  { %s758_s21 = scalar_lea.vmem %s16_s13, 256  ;;  %p763_p4 = scmp.lt.s32.totalorder %s16_s13, %s16_s13 }
   0x9   :  { %p759_p3 = scmp.ne.s32.totalorder %s16_s13, %s758_s21  ;;  %p764_p5 = scmp.lt.s32.totalorder %s758_s21, %s758_s21 }
   0xb   :  { %p765_p6 = por %p764_p5, %p763_p4 }
   0xd   :  { %p766_p7 = pnand %p765_p6, %p759_p3 }
   0xf   :  { %769 = shalt.err (!%p766_p7)
}
  0x10   :  { %s797_s22 = smov 128   ;;  %s798_s23 = smov 8  }
  0x11   :  { %21 = dma.hbm_to_vmem [thread:$0]  %s898_s0, 256, %s16_s13, [#allocation3], %s797_s22, %s797_s22, %s798_s23  }
  0x12   :  { %s799_s26 = smov [#allocation4]   ;;  %s770_s30 = scalar_lea.hbm %s899_s1, 1536 }
  0x13   :  { %s27_s27 = sshll.u32 %s799_s26, 4  ;;  %p771_p8 = scmp.ne.s32.totalorder %s899_s1, %s770_s30  ;;  %s28_s27 = int_to_ptr.vmem [resolvable:$true] %s27_s27 }
  0x14   :  { %p774_p9 = scmp.lt.u32.totalorder %s770_s30, %s899_s1 }
  0x16   :  { %p776_p10 = pnand %p774_p9, %p771_p8 }
  0x18   :  { %779 = shalt.err (!%p776_p10)
}
  0x19   :  { %s780_s8 = scalar_lea.vmem %s28_s27, 1536  ;;  %p785_p12 = scmp.lt.s32.totalorder %s28_s27, %s28_s27 }
  0x1a   :  { %p781_p11 = scmp.ne.s32.totalorder %s28_s27, %s780_s8  ;;  %p786_p13 = scmp.lt.s32.totalorder %s780_s8, %s780_s8 }
  0x1c   :  { %p787_p0 = por %p786_p13, %p785_p12 }
  0x1e   :  { %p788_p1 = pnand %p787_p0, %p781_p11 }
  0x20   :  { %791 = shalt.err (!%p788_p1)
}
  0x21   :  { %s800_s0 = smov 384   ;;  %s801_s9 = smov 24  }
  0x22   :  { %33 = dma.hbm_to_vmem [thread:$0]  %s899_s1, 1536, %s28_s27, [#allocation5], %s800_s0, %s800_s0, %s801_s9  }
  0x23   :  { %792 = dma.done.wait [#allocation3], 256  }
  0x24   :  { %793 = vsyncadd [#allocation3], 4294967040 }
  0x25   :  { %794 = dma.done.wait [#allocation5], 1536  }
  0x26   :  { %795 = vsyncadd [#allocation5], 4294965760  ;;  %v802_v0 = vmov 0.0   ;;  %v45_v1 = vld [vmem:[#allocation4 + $0x8] sm:$0xff]  ;;  %v48_v2 = vld [vmem:[#allocation4 + $0x20] sm:$0xff]  ;;  %vm73_vm0 = vcmask 261120   ;;  %v58_v21 = vlaneseq }
  0x27   :  { %144 = vmatprep.mubr.f32.mxu0 %v802_v0  ;;  %v44_v3 = vld [vmem:[#allocation4] sm:$0xff]  ;;  %v711_v4 = vpack.c.bf16 %v48_v2, %v45_v1  ;;  %v47_v5 = vld [vmem:[#allocation4 + $0x18] sm:$0xff]  ;;  %v54_v7 = vld [vmem:[#allocation4 + $0x50] sm:$0xff]  ;;  %vm803_vm1 = vmmov 0   ;;  %vm374_vm2 = vcmask 64512   ;;  %s807_s13 = smov 32  }
  0x28   :  { %v51_v6 = vld [vmem:[#allocation4 + $0x38] sm:$0xff]  ;;  %v713_v8 = vpack.c.bf16 %v47_v5, %v44_v3  ;;  %v50_v10 = vld [vmem:[#allocation4 + $0x30] sm:$0xff]  ;;  %v53_v11 = vld [vmem:[#allocation4 + $0x48] sm:$0xff]  ;;  %v865_v22 = vshrl.u32 %v58_v21, 7  ;;  %v804_v3 = vmov 1983009808  }
  0x29   :  { %v715_v9 = vpack.c.bf16 %v54_v7, %v51_v6  ;;  %v42_v12 = vld [vmem:[#allocation2] sm:$0xff]  ;;  %712 = vmatprep.subr.bf16.mxu0 %v711_v4  ;;  %v49_v14 = vld [vmem:[#allocation4 + $0x28] sm:$0xff]  ;;  %v717_v15 = vpack.c.bf16 %v53_v11, %v50_v10  ;;  %v52_v17 = vld [vmem:[#allocation4 + $0x40] sm:$0xff]  ;;  %v545_v4 = vunpack.c.l.s4 %v804_v3  ;;  %v805_v6 = vmov 1934713408   ;;  %s808_s14 = smov 96  }
  0x2a   :  { %v46_v13 = vld [vmem:[#allocation4 + $0x10] sm:$0xff]  ;;  %688 = vmatprep.mubr.msk.f32.mxu1 %vm73_vm0, %v42_v12  ;;  %714 = vmatpush1.bf16.msra.mxu0 %v713_v8  ;;  %v55_v18 = vld [vmem:[#allocation4 + $0x58] sm:$0xff]  ;;  %v64_v23 = vsub.s32 1, %v865_v22  ;;  %v60_v25 = vsub.s32 0, %v865_v22  ;;  %v68_v26 = vsub.s32 2, %v865_v22  ;;  %v576_v7 = vunpack.c.l.s4 %v805_v6 }
  0x2b   :  { %v719_v16 = vpack.c.bf16 %v49_v14, %v46_v13  ;;  %716 = vmatprep.subr.bf16.mxu0 %v715_v9  ;;  %v723_v19 = vpack.c.bf16 %v55_v18, %v52_v17  ;;  %v43_v20 = vld [vmem:[#allocation2 + $0x8] sm:$0xff]  ;;  %v56_v24 = vld [vmem:[%s900_s2] sm:$0x7]  ;;  %v546_v5 = vunpack.c.0.s8 %v545_v4  ;;  %s806_s2 = smov 64   ;;  %vm634_vm3 = vcmask 523264  }
  0x2c   :  { %v65_v27 = vrot.slane %v56_v24, %v64_v23  ;;  %v61_v29 = vrot.slane %v56_v24, %v60_v25  ;;  %v69_v31 = vrot.slane %v56_v24, %v68_v26  ;;  %v577_v11 = vunpack.c.0.s8 %v576_v7 }
  0x2d   :  { %720 = vmatprep.subr.bf16.mxu1 %v719_v16  ;;  %v549_v9 = vsub.s32 %v546_v5, %v865_v22  ;;  %vm636_vm4 = vcmask 785408  }
  0x2e   :  { %722 = vmatpush3.bf16.msra.mxu1 %v719_v16  ;;  %718 = vmatpush1.bf16.msra.mxu0 %v717_v15  ;;  %v580_v17 = vsub.s32 %v577_v11, %v865_v22 }
  0x2f   :  { %724 = vmatprep.subr.bf16.mxu1 %v723_v19  ;;  %696 = vmatprep.subr.mxu0 %v802_v0 }
  0x31   :  { %659 = vmatmul.mubr.msk.f32.vlgmr.msra.gmra.mrb[0].mxu0 %vm73_vm0, %v42_v12 }
  0x32   :  { %726 = vmatpush3.bf16.msra.mxu1 %v723_v19  ;;  %150 = vmatprep.mubr.f32.mxu0 %v802_v0 }
  0x33   :  { %691 = vmatprep.subr.mxu1 %v802_v0 }
  0x35   :  { %689 = vmatmul.mubr.msk.f32.vlgmr.msra.gmra.mrb[0].mxu1 %vm73_vm0, %v43_v20  ;;  %660 = vmatmul.mubr.msk.f32.gmra.mrb[2].mxu0 %vm73_vm0, %v43_v20 }
  0x36   :  { %693 = vmatprep.mubr.msk.f32.mxu1 %vm803_vm1, %v802_v0  ;;  %698 = vmatprep.mubr.msk.f32.mxu0 %vm803_vm1, %v802_v0 }
 0x104   :  { %v146_v28 = vpop.f32.mrb[0].mxu0 }
 0x105   :  { %v148_v30 = vpop.f32.mrb[1].mxu0  ;;  %v147_v36 = vadd.f32 %v146_v28, %v61_v29 }
 0x106   :  { %v149_v32 = vadd.f32 %v148_v30, %v65_v27 }
 0x108   :  { %v690_v33 = vpop.f32.mrb[0].mxu1  ;;  %v152_v34 = vpop.f32.mrb[2].mxu0  ;;  %692 = vmatpush3.xpose.msra.mxu1 %v149_v32 }
 0x109   :  { %v223_v35 = vpop.f32.mrb[1].mxu1  ;;  %v154_v37 = vpop.f32.mrb[3].mxu0  ;;  %701 = vmatprep.subr.mxu1 %v802_v0  ;;  %v229_v40 = vadd.f32 %v690_v33, %v69_v31  ;;  %v153_v41 = vadd.f32 %v152_v34, %v61_v29 }
 0x10a   :  { %v224_v38 = vadd.f32 %v223_v35, %v69_v31  ;;  %v155_v39 = vadd.f32 %v154_v37, %v65_v27 }
 0x10b   :  { %694 = vmatmul.mubr.f32.vlgmr.msra.gmra.mrb[2].mxu1 %v147_v36 }
 0x10c   :  { %697 = vmatpush3.xpose.msra.mxu0 %v155_v39  ;;  %702 = vmatpush3.msra.mxu1 %v224_v38 }
 0x10d   :  { %706 = vmatprep.subr.mxu0 %v802_v0  ;;  %703 = vmatprep.mubr.msk.f32.mxu1 %vm803_vm1, %v802_v0 }
 0x10f   :  { %699 = vmatmul.mubr.f32.vlgmr.msra.gmra.mrb[4].mxu0 %v153_v41 }
 0x110   :  { %707 = vmatpush3.msra.mxu0 %v229_v40  ;;  %708 = vmatprep.mubr.msk.f32.mxu0 %vm803_vm1, %v802_v0 }
 0x1de   :  { %v298_v42 = vpop.f32.mrb[2].mxu1 }
 0x1df   :  { %v372_v43 = vmul.f32 0.35355338, %v298_v42  ;;  %v695_v44 = vpop.f32.mrb[3].mxu1 }
 0x1e1   :  { %v375_v45 = vsel %vm374_vm2, %v372_v43, -inf }
 0x1e2   :  { %v368_v46 = vpop.f32.mrb[4].mxu0  ;;  %376 = vmax.xlane.f32.xlu0 %v375_v45 }
 0x1e3   :  { %v373_v47 = vmul.f32 0.35355338, %v368_v46  ;;  %v700_v48 = vpop.f32.mrb[5].mxu0 }
 0x1e5   :  { %v378_v49 = vsel %vm374_vm2, %v373_v47, -inf }
 0x1e6   :  { %379 = vmax.xlane.f32.xlu0 %v378_v49 }
 0x26f   :  { %v377_v50 = vpop.xlane.xlu0 %376 }
 0x270   :  { %v381_v51 = vsub.f32 %v372_v43, %v377_v50 }
 0x272   :  { %v383_v52 = vmul.f32 1.442695, %v381_v51 }
 0x273   :  { %v380_v53 = vpop.xlane.xlu0 %379 }
 0x274   :  { %740 = vpow2.f32 %v383_v52  ;;  %v382_v54 = vsub.f32 %v373_v47, %v380_v53 }
 0x276   :  { %v385_v55 = vmul.f32 1.442695, %v382_v54 }
 0x278   :  { %742 = vpow2.f32 %v385_v55 }
 0x27e   :  { %v741_v56 = vpop.eup %740 }
 0x27f   :  { %v387_v57 = vsel %vm374_vm2, %v741_v56, 0.0 }
 0x280   :  { %388 = vadd.xlane.f32.xlu1 %v387_v57 }
 0x282   :  { %v743_v58 = vpop.eup %742 }
 0x283   :  { %v390_v59 = vsel %vm374_vm2, %v743_v58, 0.0 }
 0x284   :  { %391 = vadd.xlane.f32.xlu1 %v390_v59 }
 0x30d   :  { %v389_v60 = vpop.xlane.xlu1 %388 }
 0x30e   :  { %744 = vrcp.f32 %v389_v60 }
 0x311   :  { %v392_v61 = vpop.xlane.xlu1 %391 }
 0x312   :  { %746 = vrcp.f32 %v392_v61 }
 0x318   :  { %v745_v62 = vpop.eup %744 }
 0x319   :  { %v394_v63 = vmul.f32 %v745_v62, %v741_v56 }
 0x31b   :  { %704 = vmatmul.mubr.msk.f32.vlgmr.msra.gmra.mrb[4].mxu1 %vm374_vm2, %v394_v63 }
 0x31c   :  { %v747_v1 = vpop.eup %746 }
 0x31d   :  { %v396_v2 = vmul.f32 %v747_v1, %v743_v58 }
 0x31f   :  { %709 = vmatmul.mubr.msk.f32.vlgmr.msra.gmra.mrb[6].mxu0 %vm374_vm2, %v396_v2 }
 0x3ee   :  { %v466_v8 = vpop.f32.mrb[4].mxu1 }
 0x3ef   :  { %v705_v10 = vpop.f32.mrb[5].mxu1  ;;  %v543_v12 = vcombine.high %v466_v8, %v802_v0  ;;  %v550_v14 = vrot.slane %v466_v8, %v549_v9 }
 0x3f1   :  { %v557_v19 = vrot.slane %v543_v12, %v549_v9 }
 0x3f2   :  { %v539_v13 = vpop.f32.mrb[6].mxu0 }
 0x3f3   :  { %v558_v15 = vcombine.high %v539_v13, %v802_v0  ;;  %v565_v16 = vrot.slane %v539_v13, %v549_v9  ;;  %v710_v18 = vpop.f32.mrb[7].mxu0 }
 0x3f5   :  { %v572_v20 = vrot.slane %v558_v15, %v549_v9  ;;  %v573_v21 = vcombine.low %v550_v14, %v565_v16  ;;  %v574_v23 = vcombine.high %v550_v14, %v565_v16 }
 0x3f7   :  { %v581_v24 = vrot.slane %v573_v21, %v580_v17  ;;  %v589_v25 = vcombine.low %v557_v19, %v572_v20  ;;  %v590_v26 = vcombine.high %v557_v19, %v572_v20  ;;  %v588_v27 = vrot.slane %v574_v23, %v580_v17 }
 0x3f9   :  { %614 = vrot.lane.b32.xlu1 %v588_v27, %s806_s2  ;;  %v605_v28 = vcombine.high %v581_v24, %v802_v0  ;;  %v604_v29 = vrot.slane %v590_v26, %v580_v17  ;;  %v597_v30 = vrot.slane %v589_v25, %v580_v17  ;;  %v606_v22 = vcombine.high %v588_v27, %v802_v0 }
 0x3fb   :  { %610 = vrot.lane.b32.xlu0 %v605_v28, %s807_s13  ;;  %v607_v31 = vcombine.high %v597_v30, %v802_v0  ;;  %v608_v32 = vcombine.high %v604_v29, %v802_v0 }
 0x3fd   :  { %626 = vrot.lane.b32.xlu1 %v604_v29, %s806_s2 }
 0x3ff   :  { %618 = vrot.lane.b32.xlu0 %v606_v22, %s808_s14 }
 0x401   :  { %622 = vrot.lane.b32.xlu1 %v607_v31, %s807_s13 }
 0x405   :  { %630 = vrot.lane.b32.xlu1 %v608_v32, %s808_s14 }
 0x46b   :  { %v615_v33 = vpop.permute.xlu1 %614 }
 0x46d   :  { %v611_v34 = vpop.permute.xlu0 %610 }
 0x46e   :  { %v633_v37 = vsel %vm73_vm0, %v581_v24, %v611_v34 }
 0x46f   :  { %v627_v35 = vpop.permute.xlu1 %626  ;;  %v635_v40 = vsel %vm634_vm3, %v633_v37, %v615_v33 }
 0x471   :  { %v619_v39 = vpop.permute.xlu0 %618 }
 0x472   :  { %v637_v43 = vsel %vm636_vm4, %v635_v40, %v619_v39 }
 0x473   :  { %v623_v36 = vpop.permute.xlu1 %622 }
 0x474   :  { %v638_v38 = vsel %vm73_vm0, %v597_v30, %v623_v36 }
 0x475   :  { %v639_v41 = vsel %vm634_vm3, %v638_v38, %v627_v35 }
 0x477   :  { %v631_v42 = vpop.permute.xlu1 %630 }
 0x478   :  { %v640_v44 = vsel %vm636_vm4, %v639_v41, %v631_v42 }
 0x479   :  { %v643_v45 = vcombine.low %v637_v43, %v640_v44 }
 0x47b   :  { %665 = vst.sshfl [vmem:[%s901_s3] sm:$0x33 pattern:$0x76325410] %v643_v45 }
 0x47c   :  { %657 = vsyncpa [#allocation3], 1 }
 0x47d   :  { %658 = vsyncpa [#allocation5], 1 }

</bundles_post_ra>
